<compile_context>
chip_gen: v5e
topology: v5e:2x2
jax: 0.10.0
libtpu: 0.0.40
codegen_flags: <defaults>
</compile_context>

<pallas_src>
from functools import partial

import jax
import jax.numpy as jnp
from jax.experimental import pallas as pl
from jax.experimental.pallas import tpu as pltpu


# ---------------------------------------------------------------------------
# Weight folding (done once per (weights, W), outside the hot path).
# A 3x3 SAME conv over a channels-last row x[h] in R^{W*Cin} is a banded
# matmul; folding the three kernel-row taps along K gives
#     out[h] = concat(x[h-1], x[h], x[h+1]) @ M + bias_row
# with M of shape (3*W*Cin, W*Cout).  Out-of-range width taps are dropped
# inside M (no width padding anywhere); the H halo is handled in-kernel.
# ---------------------------------------------------------------------------
def _build_banded_weights(w_hwio, W):
    KH, KW, Cin, Cout = w_hwio.shape
    assert (KH, KW) == (3, 3), "kernel specialized for 3x3 convs"
    # shift[dw, p, w] = 1  iff  p == w + dw - 1   (unpadded width, OOB dropped)
    shift = (jnp.arange(W)[None, :, None]
             == jnp.arange(W)[None, None, :] + jnp.arange(3)[:, None, None] - 1
             ).astype(w_hwio.dtype)                        # (3, W, W)
    m = jnp.einsum('dpw,hdio->hpiwo', shift, w_hwio)       # (3, W, Cin, W, Cout)
    return m.reshape(3 * W * Cin, W * Cout)


def _fold_bias(b, W):
    return jnp.tile(b, W).reshape(1, W * b.shape[0])       # lane w*C+c -> b[c]


# ---------------------------------------------------------------------------
# Fused kernel: conv1 + ReLU + conv2 + ReLU for one image per grid step.
#   x_ref   (1, H, W*Cin)            input slab (channels folded into lanes)
#   m1_ref  (3*W*Cin,  W*Chid)       K-folded banded weights, conv1 (resident)
#   b1_ref  (1, W*Chid)              folded bias, conv1
#   m2_ref  (3*W*Chid, W*Cout)       K-folded banded weights, conv2 (resident)
#   b2_ref  (1, W*Cout)              folded bias, conv2
#   [hook_ref] (1, H, W*Chook)       hooked activation (only if hook set)
#   out_ref (1, H, W*Cout)           final model output (lane-dense)
#   pad1/pad2                        VMEM H-halo slabs (H+2 rows)
# ---------------------------------------------------------------------------
def _make_fused_kernel(H, hook_layer):
    emit_hook = hook_layer is not None

    def kernel(x_ref, m1_ref, b1_ref, m2_ref, b2_ref, *rest):
        if emit_hook:
            hook_ref, out_ref, pad1, pad2 = rest
        else:
            out_ref, pad1, pad2 = rest
            hook_ref = None

        def conv3x3(inp, pad, m_ref, b_ref):
            wc = pad.shape[1]
            zero_row = jnp.zeros((1, wc), jnp.float32)
            pad[0:1, :] = zero_row               # H halo lives only in VMEM
            pad[H + 1:H + 2, :] = zero_row
            pad[1:H + 1, :] = inp
            # K-folded im2row: one MXU pass (K = 3*W*Cin) instead of 3 dots.
            lhs = jnp.concatenate(
                [pad[0:H, :], inp, pad[2:H + 2, :]], axis=-1)
            return (jnp.dot(lhs, m_ref[...],
                            preferred_element_type=jnp.float32)
                    + b_ref[...])

        h1 = conv3x3(x_ref[0], pad1, m1_ref, b1_ref)
        if hook_layer == "conv1":
            hook_ref[0] = h1.astype(hook_ref.dtype)
        r1 = jnp.maximum(h1, 0.0)                          # fused ReLU
        if hook_layer == "relu1":
            hook_ref[0] = r1.astype(hook_ref.dtype)

        h2 = conv3x3(r1, pad2, m2_ref, b2_ref)             # r1 never touches HBM
        if hook_layer == "conv2":
            hook_ref[0] = h2.astype(hook_ref.dtype)
        r2 = jnp.maximum(h2, 0.0)                          # fused ReLU
        if hook_layer == "relu2":
            hook_ref[0] = r2.astype(hook_ref.dtype)
        out_ref[0] = r2.astype(out_ref.dtype)

    return kernel


@partial(jax.jit, static_argnames=("hook_layer",))
def _fused_two_conv_forward(x_nchw, m1, b1f, m2, b2f, *, hook_layer=None):
    N, Cin, H, W = x_nchw.shape
    Chid = b1f.shape[-1] // W
    Cout = b2f.shape[-1] // W
    # Lane-dense (unmasked) output stores require W*C to be a multiple of 128.
    assert (W * Chid) % 128 == 0 and (W * Cout) % 128 == 0, (W, Chid, Cout)

    # NCHW -> channels-last slab, width folded into lanes.  No jnp.pad pass.
    xf = jnp.transpose(x_nchw, (0, 2, 3, 1)).reshape(N, H, W * Cin)

    emit_hook = hook_layer is not None
    hook_c = Chid if hook_layer in ("conv1", "relu1") else Cout

    out_shape = [jax.ShapeDtypeStruct((N, H, W * Cout), jnp.float32)]
    out_specs = [pl.BlockSpec((1, H, W * Cout), lambda n: (n, 0, 0))]
    if emit_hook:
        out_shape.insert(0, jax.ShapeDtypeStruct((N, H, W * hook_c), jnp.float32))
        out_specs.insert(0, pl.BlockSpec((1, H, W * hook_c), lambda n: (n, 0, 0)))

    # TODO(synk): for larger N / H, fold Nb images (or H tiles) per grid step so
    # the MXU M dim reaches >=128 (v5e) / >=256 (v6e/v7x) while keeping the grid
    # length even (both v7x TensorCores); re-derive W-tiling against v7x's
    # 64 MiB VMEM (banded M grows ~W^2) and set vmem_limit_bytes explicitly.
    results = pl.pallas_call(
        _make_fused_kernel(H, hook_layer),
        out_shape=tuple(out_shape),
        grid_spec=pltpu.PrefetchScalarGridSpec(
            num_scalar_prefetch=0,
            grid=(N,),
            in_specs=[
                pl.BlockSpec((1, H, W * Cin), lambda n: (n, 0, 0)),
                pl.BlockSpec((3 * W * Cin, W * Chid), lambda n: (0, 0)),
                pl.BlockSpec((1, W * Chid), lambda n: (0, 0)),
                pl.BlockSpec((3 * W * Chid, W * Cout), lambda n: (0, 0)),
                pl.BlockSpec((1, W * Cout), lambda n: (0, 0)),
            ],
            out_specs=tuple(out_specs),
            scratch_shapes=[
                pltpu.VMEM((H + 2, W * Cin), jnp.float32),   # conv1 H-halo slab
                pltpu.VMEM((H + 2, W * Chid), jnp.float32),  # conv2 H-halo slab
            ],
        ),
        compiler_params=pltpu.CompilerParams(
            dimension_semantics=("parallel",)),
    )(xf, m1, b1f, m2, b2f)

    def to_nchw(a, c):
        return jnp.transpose(a.reshape(N, H, W, c), (0, 3, 1, 2))

    if emit_hook:
        hooked, final = results
        return to_nchw(final, Cout), to_nchw(hooked, hook_c)
    (final,) = results
    return to_nchw(final, Cout), None


# ---------------------------------------------------------------------------
# Synthetic wrapped model (stand-in for the PyTorch `model`).  Named layers:
# "conv1", "relu1", "conv2", "relu2".  The hook callback is only invoked (and
# the hooked activation only materialized) for the registered layer.
# ---------------------------------------------------------------------------
class TinyConvModel:
    layer_names = ("conv1", "relu1", "conv2", "relu2")

    def __init__(self, key, cin=4, chid=8, cout=8):
        k1, k2, k3, k4 = jax.random.split(key, 4)
        s1 = 1.0 / (3 * 3 * cin) ** 0.5
        s2 = 1.0 / (3 * 3 * chid) ** 0.5
        self.params = {
            "conv1": {
                "w": jax.random.normal(k1, (3, 3, cin, chid), jnp.float32) * s1,
                "b": jax.random.normal(k2, (chid,), jnp.float32) * s1,
            },
            "conv2": {
                "w": jax.random.normal(k3, (3, 3, chid, cout), jnp.float32) * s2,
                "b": jax.random.normal(k4, (cout,), jnp.float32) * s2,
            },
        }
        self._folded_cache = {}   # width -> (m1, b1f, m2, b2f), built once

    def _folded(self, W):
        if W not in self._folded_cache:
            p1, p2 = self.params["conv1"], self.params["conv2"]
            self._folded_cache[W] = (
                _build_banded_weights(p1["w"], W), _fold_bias(p1["b"], W),
                _build_banded_weights(p2["w"], W), _fold_bias(p2["b"], W),
            )
        return self._folded_cache[W]

    def __call__(self, x_nchw, hook=None, hooked_layer=None):
        """x_nchw: (N, Cin, H, W), like the PyTorch model. Emulates forward hooks."""
        assert hooked_layer is None or hooked_layer in self.layer_names
        m1, b1f, m2, b2f = self._folded(x_nchw.shape[-1])
        out, hooked = _fused_two_conv_forward(
            x_nchw, m1, b1f, m2, b2f, hook_layer=hooked_layer)
        if hooked is not None and hook is not None:
            hook(hooked_layer, hooked)
        return out                                          # NCHW model output


# ---------------------------------------------------------------------------
# ActivationExtractor: faithful port of the PyTorch module's forward semantics.
# forward(x) runs the full wrapped model and returns the hooked activation.
# ---------------------------------------------------------------------------
class ActivationExtractor:
    def __init__(self, model, layer_name):
        self.model = model
        self.activations = None
        self.hook = None
        self.layer_name = layer_name

    def forward_hook(self, name, output):
        self.activations = output

    def register_hook(self):
        for name in self.model.layer_names:    # ~ model.named_modules()
            if name == self.layer_name:
                self.hook = name
                break

    def unregister_hook(self):
        if self.hook:
            self.hook = None

    def __call__(self, x):
        if self.hook is not None:
            _ = self.model(x, hook=self.forward_hook, hooked_layer=self.hook)
        else:
            _ = self.model(x)
        return self.activations


if __name__ == "__main__":
    key = jax.random.PRNGKey(0)
    kx, kp = jax.random.split(key)

    # small shapes, NCHW like PyTorch: batch=2, channels=4, spatial=16
    x = jax.random.normal(kx, (2, 4, 16, 16), jnp.float32)

    model = TinyConvModel(kp, cin=4, chid=8, cout=8)
    extractor = ActivationExtractor(model, layer_name="relu1")
    extractor.register_hook()

    act = jax.block_until_ready(extractor(x))
    assert act.shape == (2, 8, 16, 16), act.shape

    # ---- correctness vs. XLA reference convs -------------------------------
    def ref_conv(a_nhwc, w, b):
        y = jax.lax.conv_general_dilated(
            a_nhwc, w, window_strides=(1, 1), padding="SAME",
            dimension_numbers=("NHWC", "HWIO", "NHWC"),
            precision=jax.lax.Precision.HIGHEST)
        return y + b

    x_nhwc = jnp.transpose(x, (0, 2, 3, 1))
    r1_ref = jnp.maximum(
        ref_conv(x_nhwc, model.params["conv1"]["w"], model.params["conv1"]["b"]), 0.0)
    err1 = float(jnp.max(jnp.abs(jnp.transpose(r1_ref, (0, 3, 1, 2)) - act)))
    assert err1 < 1e-3, f"relu1 mismatch {err1}"

    # also exercise / validate the un-hooked path and the fused conv2 stage
    out = jax.block_until_ready(model(x))
    r2_ref = jnp.maximum(
        ref_conv(r1_ref, model.params["conv2"]["w"], model.params["conv2"]["b"]), 0.0)
    err2 = float(jnp.max(jnp.abs(jnp.transpose(r2_ref, (0, 3, 1, 2)) - out)))
    assert err2 < 1e-3, f"relu2 mismatch {err2}"

    print("KERNEL_OK")
</pallas_src>

<mosaic_0001>
module attributes {stable_mosaic.version = 11 : i64} {
  func.func @kernel(%arg0: i32, %arg1: memref<1x16x64xf32, #tpu.memory_space<vmem>>, %arg2: memref<192x128xf32, #tpu.memory_space<vmem>>, %arg3: memref<1x128xf32, #tpu.memory_space<vmem>>, %arg4: memref<384x128xf32, #tpu.memory_space<vmem>>, %arg5: memref<1x128xf32, #tpu.memory_space<vmem>>, %arg6: memref<1x16x128xf32, #tpu.memory_space<vmem>>, %arg7: memref<1x16x128xf32, #tpu.memory_space<vmem>>, %arg8: memref<18x64xf32, #tpu.memory_space<vmem>>, %arg9: memref<18x128xf32, #tpu.memory_space<vmem>>) attributes {dimension_semantics = [#tpu.dimension_semantics<parallel>], iteration_bounds = array<i64: 2>, scalar_prefetch = 0 : i64, scratch_operands = 2 : i64, tpu.core_type = #tpu.core_type<tc>, window_params = [{transform_indices = @transform_0, window_bounds = array<i64: 1, 16, 64>}, {pipeline_mode = #tpu.pipeline_mode<synchronous>, transform_indices = @transform_1, window_bounds = array<i64: 192, 128>}, {pipeline_mode = #tpu.pipeline_mode<synchronous>, transform_indices = @transform_2, window_bounds = array<i64: 1, 128>}, {pipeline_mode = #tpu.pipeline_mode<synchronous>, transform_indices = @transform_3, window_bounds = array<i64: 384, 128>}, {pipeline_mode = #tpu.pipeline_mode<synchronous>, transform_indices = @transform_4, window_bounds = array<i64: 1, 128>}, {transform_indices = @transform_5, window_bounds = array<i64: 1, 16, 128>}, {transform_indices = @transform_6, window_bounds = array<i64: 1, 16, 128>}]} {
    %c0 = arith.constant 0 : index
    %c0_0 = arith.constant 0 : index
    %c0_1 = arith.constant 0 : index
    %0 = vector.load %arg1[%c0, %c0_0, %c0_1] : memref<1x16x64xf32, #tpu.memory_space<vmem>>, vector<1x16x64xf32>
    %1 = vector.shape_cast %0 : vector<1x16x64xf32> to vector<16x64xf32>
    %cst = arith.constant 0.000000e+00 : f32
    %2 = vector.broadcast %cst : f32 to vector<1x64xf32>
    %c0_2 = arith.constant 0 : index
    %c0_3 = arith.constant 0 : index
    %3 = vector.load %arg8[%c0_2, %c0_3] : memref<18x64xf32, #tpu.memory_space<vmem>>, vector<1x64xf32>
    tpu.vector_store %arg8[%c0_2, %c0_3], %2 {strides = array<i32>} : memref<18x64xf32, #tpu.memory_space<vmem>>, vector<1x64xf32>,
    %c17 = arith.constant 17 : index
    %c0_4 = arith.constant 0 : index
    %4 = vector.load %arg8[%c17, %c0_4] : memref<18x64xf32, #tpu.memory_space<vmem>>, vector<1x64xf32>
    tpu.vector_store %arg8[%c17, %c0_4], %2 {strides = array<i32>} : memref<18x64xf32, #tpu.memory_space<vmem>>, vector<1x64xf32>,
    %c1 = arith.constant 1 : index
    %c0_5 = arith.constant 0 : index
    %5 = vector.load %arg8[%c1, %c0_5] : memref<18x64xf32, #tpu.memory_space<vmem>>, vector<16x64xf32>
    tpu.vector_store %arg8[%c1, %c0_5], %1 {strides = array<i32>} : memref<18x64xf32, #tpu.memory_space<vmem>>, vector<16x64xf32>,
    %c0_6 = arith.constant 0 : index
    %c0_7 = arith.constant 0 : index
    %6 = vector.load %arg8[%c0_6, %c0_7] : memref<18x64xf32, #tpu.memory_space<vmem>>, vector<16x64xf32>
    %c2 = arith.constant 2 : index
    %c0_8 = arith.constant 0 : index
    %7 = vector.load %arg8[%c2, %c0_8] : memref<18x64xf32, #tpu.memory_space<vmem>>, vector<16x64xf32>
    %8 = tpu.concatenate %6, %1, %7 in 1 : vector<16x64xf32>, vector<16x64xf32>, vector<16x64xf32> -> vector<16x192xf32>
    %c0_9 = arith.constant 0 : index
    %c0_10 = arith.constant 0 : index
    %9 = vector.load %arg2[%c0_9, %c0_10] : memref<192x128xf32, #tpu.memory_space<vmem>>, vector<192x128xf32>
    %cst_11 = arith.constant dense<0.000000e+00> : vector<16x128xf32>
    %10 = tpu.matmul %8, %9, %cst_11 {dimension_numbers = #tpu.dot_dimension_numbers<[1], [0], [0], [1], [0, 0, 1, 1], [], []>} : vector<16x192xf32>, vector<192x128xf32>, vector<16x128xf32> -> vector<16x128xf32>
    %c0_12 = arith.constant 0 : index
    %c0_13 = arith.constant 0 : index
    %11 = vector.load %arg3[%c0_12, %c0_13] : memref<1x128xf32, #tpu.memory_space<vmem>>, vector<1x128xf32>
    %12 = vector.broadcast %11 : vector<1x128xf32> to vector<16x128xf32>
    %13 = arith.addf %10, %12 : vector<16x128xf32>
    %cst_14 = arith.constant 0.000000e+00 : f32
    %14 = vector.broadcast %cst_14 : f32 to vector<16x128xf32>
    %15 = arith.maximumf %13, %14 : vector<16x128xf32>
    %c0_15 = arith.constant 0 : index
    %c0_16 = arith.constant 0 : index
    %c0_17 = arith.constant 0 : index
    %16 = vector.load %arg6[%c0_15, %c0_16, %c0_17] : memref<1x16x128xf32, #tpu.memory_space<vmem>>, vector<1x16x128xf32>
    %17 = vector.shape_cast %16 : vector<1x16x128xf32> to vector<16x128xf32>
    %18 = vector.shape_cast %15 : vector<16x128xf32> to vector<1x16x128xf32>
    tpu.vector_store %arg6[%c0_15, %c0_16, %c0_17], %18 {strides = array<i32>} : memref<1x16x128xf32, #tpu.memory_space<vmem>>, vector<1x16x128xf32>,
    %cst_18 = arith.constant 0.000000e+00 : f32
    %19 = vector.broadcast %cst_18 : f32 to vector<1x128xf32>
    %c0_19 = arith.constant 0 : index
    %c0_20 = arith.constant 0 : index
    %20 = vector.load %arg9[%c0_19, %c0_20] : memref<18x128xf32, #tpu.memory_space<vmem>>, vector<1x128xf32>
    tpu.vector_store %arg9[%c0_19, %c0_20], %19 {strides = array<i32>} : memref<18x128xf32, #tpu.memory_space<vmem>>, vector<1x128xf32>,
    %c17_21 = arith.constant 17 : index
    %c0_22 = arith.constant 0 : index
    %21 = vector.load %arg9[%c17_21, %c0_22] : memref<18x128xf32, #tpu.memory_space<vmem>>, vector<1x128xf32>
    tpu.vector_store %arg9[%c17_21, %c0_22], %19 {strides = array<i32>} : memref<18x128xf32, #tpu.memory_space<vmem>>, vector<1x128xf32>,
    %c1_23 = arith.constant 1 : index
    %c0_24 = arith.constant 0 : index
    %22 = vector.load %arg9[%c1_23, %c0_24] : memref<18x128xf32, #tpu.memory_space<vmem>>, vector<16x128xf32>
    tpu.vector_store %arg9[%c1_23, %c0_24], %15 {strides = array<i32>} : memref<18x128xf32, #tpu.memory_space<vmem>>, vector<16x128xf32>,
    %c0_25 = arith.constant 0 : index
    %c0_26 = arith.constant 0 : index
    %23 = vector.load %arg9[%c0_25, %c0_26] : memref<18x128xf32, #tpu.memory_space<vmem>>, vector<16x128xf32>
    %c2_27 = arith.constant 2 : index
    %c0_28 = arith.constant 0 : index
    %24 = vector.load %arg9[%c2_27, %c0_28] : memref<18x128xf32, #tpu.memory_space<vmem>>, vector<16x128xf32>
    %25 = tpu.concatenate %23, %15, %24 in 1 : vector<16x128xf32>, vector<16x128xf32>, vector<16x128xf32> -> vector<16x384xf32>
    %c0_29 = arith.constant 0 : index
    %c0_30 = arith.constant 0 : index
    %26 = vector.load %arg4[%c0_29, %c0_30] : memref<384x128xf32, #tpu.memory_space<vmem>>, vector<384x128xf32>
    %cst_31 = arith.constant dense<0.000000e+00> : vector<16x128xf32>
    %27 = tpu.matmul %25, %26, %cst_31 {dimension_numbers = #tpu.dot_dimension_numbers<[1], [0], [0], [1], [0, 0, 1, 1], [], []>} : vector<16x384xf32>, vector<384x128xf32>, vector<16x128xf32> -> vector<16x128xf32>
    %c0_32 = arith.constant 0 : index
    %c0_33 = arith.constant 0 : index
    %28 = vector.load %arg5[%c0_32, %c0_33] : memref<1x128xf32, #tpu.memory_space<vmem>>, vector<1x128xf32>
    %29 = vector.broadcast %28 : vector<1x128xf32> to vector<16x128xf32>
    %30 = arith.addf %27, %29 : vector<16x128xf32>
    %cst_34 = arith.constant 0.000000e+00 : f32
    %31 = vector.broadcast %cst_34 : f32 to vector<16x128xf32>
    %32 = arith.maximumf %30, %31 : vector<16x128xf32>
    %c0_35 = arith.constant 0 : index
    %c0_36 = arith.constant 0 : index
    %c0_37 = arith.constant 0 : index
    %33 = vector.load %arg7[%c0_35, %c0_36, %c0_37] : memref<1x16x128xf32, #tpu.memory_space<vmem>>, vector<1x16x128xf32>
    %34 = vector.shape_cast %33 : vector<1x16x128xf32> to vector<16x128xf32>
    %35 = vector.shape_cast %32 : vector<16x128xf32> to vector<1x16x128xf32>
    tpu.vector_store %arg7[%c0_35, %c0_36, %c0_37], %35 {strides = array<i32>} : memref<1x16x128xf32, #tpu.memory_space<vmem>>, vector<1x16x128xf32>,
    return
  }
  func.func @transform_0(%arg0: i32) -> (i32, i32, i32) {
    %c0_i32 = arith.constant 0 : i32
    %c0_i32_0 = arith.constant 0 : i32
    %c0_i32_1 = arith.constant 0 : i32
    return %arg0, %c0_i32, %c0_i32_0 : i32, i32, i32
  }
  func.func @transform_1(%arg0: i32) -> (i32, i32) {
    %c0_i32 = arith.constant 0 : i32
    %c0_i32_0 = arith.constant 0 : i32
    %c0_i32_1 = arith.constant 0 : i32
    return %c0_i32, %c0_i32_0 : i32, i32
  }
  func.func @transform_2(%arg0: i32) -> (i32, i32) {
    %c0_i32 = arith.constant 0 : i32
    %c0_i32_0 = arith.constant 0 : i32
    %c0_i32_1 = arith.constant 0 : i32
    return %c0_i32, %c0_i32_0 : i32, i32
  }
  func.func @transform_3(%arg0: i32) -> (i32, i32) {
    %c0_i32 = arith.constant 0 : i32
    %c0_i32_0 = arith.constant 0 : i32
    %c0_i32_1 = arith.constant 0 : i32
    return %c0_i32, %c0_i32_0 : i32, i32
  }
  func.func @transform_4(%arg0: i32) -> (i32, i32) {
    %c0_i32 = arith.constant 0 : i32
    %c0_i32_0 = arith.constant 0 : i32
    %c0_i32_1 = arith.constant 0 : i32
    return %c0_i32, %c0_i32_0 : i32, i32
  }
  func.func @transform_5(%arg0: i32) -> (i32, i32, i32) {
    %c0_i32 = arith.constant 0 : i32
    %c0_i32_0 = arith.constant 0 : i32
    %c0_i32_1 = arith.constant 0 : i32
    return %arg0, %c0_i32, %c0_i32_0 : i32, i32, i32
  }
  func.func @transform_6(%arg0: i32) -> (i32, i32, i32) {
    %c0_i32 = arith.constant 0 : i32
    %c0_i32_0 = arith.constant 0 : i32
    %c0_i32_1 = arith.constant 0 : i32
    return %arg0, %c0_i32, %c0_i32_0 : i32, i32, i32
  }
}

</mosaic_0001>

<bundles_post_ra>
// kernel: _fused_two_conv_forward.1
= control target key start
LH: loop header
LB: loop body
LE: loop exit
PB: predicated region body
PF: predicated region fallthrough
CT: control target
= control target key end

     0   :  { %12 = vsyncpa [#allocation5], 0  ;;  %s748_s21 = smov 0   ;;  %s932_s0 = inlined_call_operand.vmem [shape: f32[2,16,64], index: 0, kind: input, shape index: {}]   ;;  %s933_s1 = inlined_call_operand.hbm [shape: f32[192,128], index: 1, kind: input, shape index: {}]   ;;  %s934_s2 = inlined_call_operand.vmem [shape: f32[1,128], index: 2, kind: input, shape index: {}]   ;;  %s935_s3 = inlined_call_operand.vmem [shape: f32[384,128], index: 3, kind: input, shape index: {}]   ;;  %s936_s4 = inlined_call_operand.vmem [shape: f32[1,128], index: 4, kind: input, shape index: {}]   ;;  %s937_s5 = inlined_call_operand.vmem [shape: f32[2,16,128], index: 5, kind: output, shape index: {0}]   ;;  %s938_s6 = inlined_call_operand.vmem [shape: f32[2,16,128], index: 6, kind: output, shape index: {1}]  }
   0x1 LB: > { %s196_s24 = sshll.u32 %s933_s1, 4  ;;  %s621_s25 = sadd.s32 4294967295, %s706_s21   ;;  %s706_s21 = sphi %s748_s21, %s18_s21   ;;  %s197_s24 = int_to_ptr.hbm [resolvable:$true] %s196_s24 }
   0x2   : > { %p623_p0 = scmp.ge.s32.totalorder %s706_s21, 1  ;;  %p185_p1 = scmp.lt.s32.totalorder %s706_s21, 3 }
   0x3   : > { %p649_p2 = scmp.eq.s32.totalorder %s621_s25, 0  ;;  %s708_s26 = smov [#allocation4]  }
   0x4   : > { %p186_p3 = pnand %p623_p0, %p185_p1  ;;  %s198_s27 = sshll.u32 %s708_s26, 4  ;;  %s199_s27 = int_to_ptr.vmem [resolvable:$true] %s198_s27 }
   0x5   : > { %s709_s28 = smov 128   ;;  %s710_s29 = smov 8  }
   0x6   : > { %p645_p4 = pneg %p186_p3  ;;  %231 = sbr.rel (%p186_p3) target bundleno = 424 (0x1a8), region = 40 }
   0x8   : > { %p646_p5 = pnand %p649_p2, %p645_p4 }
   0xa   : > { %648 = dma.hbm_to_vmem [thread:$0]  (!%p646_p5), %s197_s24, 3072, %s199_s27, [#allocation5], %s709_s28, %s709_s28, %s710_s29  }
   0xb   : > { %701 = dma.done.wait (%p649_p2), [#allocation5], 3072  }
   0xc   : > { %703 = vsyncadd (%p649_p2), [#allocation5], 4294964224  ;;  %p267_p6 = scmp.lt.s32.totalorder %s621_s25, 1  ;;  %vm287_vm0 = vcmask 523264   ;;  %v319_v1 = vld [vmem:[#allocation4 + $0x78] sm:$0xff]  ;;  %s711_s10 = smov 64  }
   0xd   : > { %338 = vmatpush.msra.mxu0 %v319_v1  ;;  %v318_v3 = vld [vmem:[#allocation4 + $0x70] sm:$0xff]  ;;  %v317_v4 = vld [vmem:[#allocation4 + $0x68] sm:$0xff]  ;;  %v316_v5 = vld [vmem:[#allocation4 + $0x60] sm:$0xff]  ;;  %vm284_vm1 = vcmask 516096   ;;  %v712_v23 = vmov 0.0  }
   0xe   : > { %s940_s25 = smov (!%p267_p6, %s621_s25), 1  ;;  %v327_v6 = vld [vmem:[#allocation4 + $0xb8] sm:$0xff]  ;;  %v326_v7 = vld [vmem:[#allocation4 + $0xb0] sm:$0xff]  ;;  %v325_v9 = vld [vmem:[#allocation4 + $0xa8] sm:$0xff]  ;;  %285 = vst.msk [vmem:[#allocation2] sm:$0x1] %vm284_vm1, %v712_v23 }
   0xf   : > { %s759_s30 = sshll.u32 %s940_s25, 4  ;;  %339 = vmatpush.msra.mxu0 %v318_v3  ;;  %369 = vmatpush.msra.mxu1 %v327_v6  ;;  %v315_v8 = vld [vmem:[#allocation4 + $0x58] sm:$0xff]  ;;  %v314_v10 = vld [vmem:[#allocation4 + $0x50] sm:$0xff]  ;;  %v324_v11 = vld [vmem:[#allocation4 + $0xa0] sm:$0xff]  ;;  %286 = vst.msk [vmem:[#allocation2 + $0x11] sm:$0x1] %vm284_vm1, %v712_v23 }
  0x10   : > { %s271_s9 = scalar_lea.vmem %s932_s0, %s759_s30  ;;  %v313_v12 = vld [vmem:[#allocation4 + $0x48] sm:$0xff]  ;;  %v323_v13 = vld [vmem:[#allocation4 + $0x98] sm:$0xff]  ;;  %v312_v14 = vld [vmem:[#allocation4 + $0x40] sm:$0xff]  ;;  %388 = vst [vmem:[#allocation3] sm:$0x1] %v712_v23  ;;  %s276_s24 = scalar_lea.vmem %s937_s5, %s759_s30 }
  0x11   : > { %v282_v0 = vld [vmem:[%s271_s9] sm:$0xff]  ;;  %v283_v2 = vld [vmem:[%s271_s9 + $0x8] sm:$0xff]  ;;  %340 = vmatpush.msra.mxu0 %v317_v4  ;;  %370 = vmatpush.msra.mxu1 %v326_v7  ;;  %v309_v18 = vld [vmem:[#allocation4 + $0x28] sm:$0xff]  ;;  %389 = vst [vmem:[#allocation3 + $0x11] sm:$0x1] %v712_v23  ;;  %s281_s29 = scalar_lea.vmem %s938_s6, %s759_s30 }
  0x12   : > { %296 = vrot.lane.b32.xlu0 %v282_v0, %s711_s10  ;;  %288 = vst.msk [vmem:[#allocation2 + $0x1] sm:$0xff] %vm287_vm0, %v282_v0  ;;  %v322_v15 = vld [vmem:[#allocation4 + $0x90] sm:$0xff]  ;;  %v311_v16 = vld [vmem:[#allocation4 + $0x38] sm:$0xff]  ;;  %v308_v19 = vld [vmem:[#allocation4 + $0x20] sm:$0xff] }
  0x13   : > { %289 = vst.msk [vmem:[#allocation2 + $0x9] sm:$0xff] %vm287_vm0, %v283_v2  ;;  %341 = vmatpush.msra.mxu0 %v316_v5  ;;  %371 = vmatpush.msra.mxu1 %v325_v9  ;;  %v310_v17 = vld [vmem:[#allocation4 + $0x30] sm:$0xff]  ;;  %v307_v20 = vld [vmem:[#allocation4 + $0x18] sm:$0xff]  ;;  %v305_v22 = vld [vmem:[#allocation4 + $0x8] sm:$0xff] }
  0x14   : > { %v306_v21 = vld [vmem:[#allocation4 + $0x10] sm:$0xff]  ;;  %v304_v24 = vld [vmem:[#allocation4] sm:$0xff]  ;;  %v321_v25 = vld [vmem:[#allocation4 + $0x88] sm:$0xff] }
  0x15   : > { %342 = vmatpush.msra.mxu0 %v315_v8  ;;  %372 = vmatpush.msra.mxu1 %v324_v11  ;;  %v320_v26 = vld [vmem:[#allocation4 + $0x80] sm:$0xff]  ;;  %v427_v29 = vld [vmem:[%s935_s3 + $0xf8] sm:$0xff]  ;;  %v425_v32 = vld [vmem:[%s935_s3 + $0xe8] sm:$0xff] }
  0x16   : > { %v426_v30 = vld [vmem:[%s935_s3 + $0xf0] sm:$0xff]  ;;  %471 = vmatpush.msra.mxu3 %v427_v29  ;;  %v411_v31 = vld [vmem:[%s935_s3 + $0x78] sm:$0xff]  ;;  %v409_v34 = vld [vmem:[%s935_s3 + $0x68] sm:$0xff] }
  0x17   : > { %343 = vmatpush.msra.mxu0 %v314_v10  ;;  %373 = vmatpush.msra.mxu1 %v323_v13  ;;  %v410_v33 = vld [vmem:[%s935_s3 + $0x70] sm:$0xff]  ;;  %v424_v35 = vld [vmem:[%s935_s3 + $0xe0] sm:$0xff]  ;;  %v443_v37 = vld [vmem:[%s935_s3 + $0x178] sm:$0xff] }
  0x18   : > { %448 = vmatpush.msra.mxu2 %v411_v31  ;;  %472 = vmatpush.msra.mxu3 %v426_v30  ;;  %v408_v36 = vld [vmem:[%s935_s3 + $0x60] sm:$0xff]  ;;  %v423_v38 = vld [vmem:[%s935_s3 + $0xd8] sm:$0xff]  ;;  %v442_v39 = vld [vmem:[%s935_s3 + $0x170] sm:$0xff] }
  0x19   : > { %344 = vmatpush.msra.mxu0 %v313_v12  ;;  %374 = vmatpush.msra.mxu1 %v322_v15  ;;  %v407_v40 = vld [vmem:[%s935_s3 + $0x58] sm:$0xff]  ;;  %v441_v41 = vld [vmem:[%s935_s3 + $0x168] sm:$0xff]  ;;  %v422_v42 = vld [vmem:[%s935_s3 + $0xd0] sm:$0xff] }
  0x1a   : > { %298 = vrot.lane.b32.xlu0 %v283_v2, %s711_s10  ;;  %v292_v27 = vld [vmem:[#allocation2 + $0x2] sm:$0xff]  ;;  %v293_v28 = vld [vmem:[#allocation2 + $0xa] sm:$0xff]  ;;  %449 = vmatpush.msra.mxu2 %v410_v33  ;;  %v419_v49 = vld [vmem:[%s935_s3 + $0xb8] sm:$0xff] }
  0x1b   : > { %345 = vmatpush.msra.mxu0 %v312_v14  ;;  %375 = vmatpush.msra.mxu1 %v321_v25  ;;  %v406_v43 = vld [vmem:[%s935_s3 + $0x50] sm:$0xff]  ;;  %v440_v44 = vld [vmem:[%s935_s3 + $0x160] sm:$0xff]  ;;  %v421_v45 = vld [vmem:[%s935_s3 + $0xc8] sm:$0xff] }
  0x1c   : > { %473 = vmatpush.msra.mxu3 %v425_v32  ;;  %450 = vmatpush.msra.mxu2 %v409_v34  ;;  %v405_v46 = vld [vmem:[%s935_s3 + $0x48] sm:$0xff]  ;;  %v420_v47 = vld [vmem:[%s935_s3 + $0xc0] sm:$0xff]  ;;  %v418_v50 = vld [vmem:[%s935_s3 + $0xb0] sm:$0xff] }
  0x1d   : > { %346 = vmatpush.msra.mxu0 %v311_v16  ;;  %376 = vmatpush.msra.mxu1 %v320_v26  ;;  %v404_v48 = vld [vmem:[%s935_s3 + $0x40] sm:$0xff]  ;;  %v417_v51 = vld [vmem:[%s935_s3 + $0xa8] sm:$0xff]  ;;  %v403_v59 = vld [vmem:[%s935_s3 + $0x38] sm:$0xff] }
  0x1e   : > { %634 = vmatmul.msk.f32.vlgmr.msra.gmra.mxu1 %vm287_vm0, %v292_v27  ;;  %474 = vmatpush.msra.mxu3 %v424_v35  ;;  %v290_v52 = vld [vmem:[#allocation2] sm:$0xff]  ;;  %v291_v56 = vld [vmem:[#allocation2 + $0x8] sm:$0xff]  ;;  %v415_v60 = vld [vmem:[%s935_s3 + $0x98] sm:$0xff] }
  0x1f   : > { %347 = vmatpush.msra.mxu0 %v310_v17  ;;  %494 = vmatpush.msrb.mxu1 %v443_v37  ;;  %v416_v53 = vld [vmem:[%s935_s3 + $0xa0] sm:$0xff]  ;;  %v439_v61 = vld [vmem:[%s935_s3 + $0x158] sm:$0xff]  ;;  %v402_v62 = vld [vmem:[%s935_s3 + $0x30] sm:$0xff] }
  0x20   : > { %451 = vmatpush.msra.mxu2 %v408_v36  ;;  %475 = vmatpush.msra.mxu3 %v423_v38  ;;  %v414_v63 = vld [vmem:[%s935_s3 + $0x90] sm:$0xff]  ;;  %v401_v1 = vld [vmem:[%s935_s3 + $0x28] sm:$0xff]  ;;  %v400_v4 = vld [vmem:[%s935_s3 + $0x20] sm:$0xff] }
  0x21   : > { %348 = vmatpush.msra.mxu0 %v309_v18  ;;  %495 = vmatpush.msrb.mxu1 %v442_v39  ;;  %v438_v0 = vld [vmem:[%s935_s3 + $0x150] sm:$0xff]  ;;  %v413_v2 = vld [vmem:[%s935_s3 + $0x88] sm:$0xff]  ;;  %v412_v5 = vld [vmem:[%s935_s3 + $0x80] sm:$0xff] }
  0x22   : > { %452 = vmatpush.msra.mxu2 %v407_v40  ;;  %476 = vmatpush.msra.mxu3 %v422_v42  ;;  %v437_v3 = vld [vmem:[%s935_s3 + $0x148] sm:$0xff]  ;;  %v436_v6 = vld [vmem:[%s935_s3 + $0x140] sm:$0xff]  ;;  %v399_v7 = vld [vmem:[%s935_s3 + $0x18] sm:$0xff] }
  0x23   : > { %349 = vmatpush.msra.mxu0 %v308_v19  ;;  %496 = vmatpush.msrb.mxu1 %v441_v41  ;;  %v435_v8 = vld [vmem:[%s935_s3 + $0x138] sm:$0xff]  ;;  %v398_v9 = vld [vmem:[%s935_s3 + $0x10] sm:$0xff]  ;;  %v397_v11 = vld [vmem:[%s935_s3 + $0x8] sm:$0xff] }
  0x24   : > { %453 = vmatpush.msra.mxu2 %v406_v43  ;;  %477 = vmatpush.msra.mxu3 %v421_v45  ;;  %v434_v10 = vld [vmem:[%s935_s3 + $0x130] sm:$0xff]  ;;  %v433_v12 = vld [vmem:[%s935_s3 + $0x128] sm:$0xff]  ;;  %v396_v13 = vld [vmem:[%s935_s3] sm:$0xff] }
  0x25   : > { %350 = vmatpush.msra.mxu0 %v307_v20  ;;  %497 = vmatpush.msrb.mxu1 %v440_v44  ;;  %v432_v14 = vld [vmem:[%s935_s3 + $0x120] sm:$0xff]  ;;  %v431_v15 = vld [vmem:[%s935_s3 + $0x118] sm:$0xff]  ;;  %v430_v16 = vld [vmem:[%s935_s3 + $0x110] sm:$0xff] }
  0x26   : > { %635 = vmatmul.msk.f32.gmra.mxu1 %vm287_vm0, %v293_v28  ;;  %454 = vmatpush.msra.mxu2 %v405_v46  ;;  %v429_v17 = vld [vmem:[%s935_s3 + $0x108] sm:$0xff]  ;;  %v428_v18 = vld [vmem:[%s935_s3 + $0x100] sm:$0xff] }
  0x27   : > { %351 = vmatpush.msra.mxu0 %v306_v21  ;;  %478 = vmatpush.msra.mxu3 %v420_v47  ;;  %v664_v19 = vld [vmem:[%s934_s2] ss:$0 sm:$0xff] }
  0x28   : > { %455 = vmatpush.msra.mxu2 %v404_v48  ;;  %498 = vmatpush.msrb.mxu1 %v439_v61  ;;  %v665_v34 = vld [vmem:[%s936_s4] ss:$0 sm:$0xff] }
  0x29   : > { %352 = vmatpush.msra.mxu0 %v305_v22  ;;  %479 = vmatpush.msra.mxu3 %v419_v49 }
  0x2a   : > { %456 = vmatpush.msra.mxu2 %v403_v59  ;;  %499 = vmatpush.msrb.mxu1 %v438_v0 }
  0x2b   : > { %353 = vmatpush.msra.mxu0 %v304_v24  ;;  %480 = vmatpush.msra.mxu3 %v418_v50 }
  0x2c   : > { %457 = vmatpush.msra.mxu2 %v402_v62  ;;  %500 = vmatpush.msrb.mxu1 %v437_v3 }
  0x2d   : > { %481 = vmatpush.msra.mxu3 %v417_v51 }
  0x2e   : > { %458 = vmatpush.msra.mxu2 %v401_v1  ;;  %501 = vmatpush.msrb.mxu1 %v436_v6 }
  0x2f   : > { %482 = vmatpush.msra.mxu3 %v416_v53 }
  0x30   : > { %459 = vmatpush.msra.mxu2 %v400_v4  ;;  %502 = vmatpush.msrb.mxu1 %v435_v8 }
  0x31   : > { %483 = vmatpush.msra.mxu3 %v415_v60 }
  0x32   : > { %460 = vmatpush.msra.mxu2 %v399_v7  ;;  %503 = vmatpush.msrb.mxu1 %v434_v10 }
  0x33   : > { %484 = vmatpush.msra.mxu3 %v414_v63 }
  0x34   : > { %461 = vmatpush.msra.mxu2 %v398_v9  ;;  %504 = vmatpush.msrb.mxu1 %v433_v12 }
  0x35   : > { %485 = vmatpush.msra.mxu3 %v413_v2 }
  0x36   : > { %462 = vmatpush.msra.mxu2 %v397_v11  ;;  %505 = vmatpush.msrb.mxu1 %v432_v14 }
  0x37   : > { %486 = vmatpush.msra.mxu3 %v412_v5 }
  0x38   : > { %463 = vmatpush.msra.mxu2 %v396_v13  ;;  %506 = vmatpush.msrb.mxu1 %v431_v15 }
  0x3a   : > { %507 = vmatpush.msrb.mxu1 %v430_v16 }
  0x3c   : > { %508 = vmatpush.msrb.mxu1 %v429_v17 }
  0x3e   : > { %509 = vmatpush.msrb.mxu1 %v428_v18 }
  0x84   : > { %v297_v54 = vpop.permute.xlu0 %296 }
  0x85   : > { %v302_v55 = vsel %vm287_vm0, %v290_v52, %v297_v54 }
  0x86   : > { %354 = vmatmul.f32.vlgmr.msra.gmra.mxu0 %v302_v55 }
  0x8c   : > { %v299_v57 = vpop.permute.xlu0 %298 }
  0x8d   : > { %v303_v58 = vsel %vm287_vm0, %v291_v56, %v299_v57 }
  0x8e   : > { %357 = vmatmul.f32.gmra.mxu0 %v303_v58 }
  0x9b   : > { %v378_v20 = vpop.f32.mrf.mxu1 }
  0xa3   : > { %v381_v26 = vpop.f32.mrf.mxu1 }
 0x103   : > { %v355_v21 = vpop.f32.mrf.mxu0 }
 0x104   : > { %v356_v22 = vadd.f32 %v664_v19, %v355_v21 }
 0x106   : > { %v379_v23 = vadd.f32 %v378_v20, %v356_v22 }
 0x108   : > { %v384_v24 = vmax.f32 %v379_v23, 0.0 }
 0x10a   : > { %386 = vst [vmem:[%s276_s24] sm:$0xff] %v384_v24  ;;  %487 = vmatmul.f32.vlgmr.msra.gmra.mxu3 %v384_v24 }
 0x10b   : > { %390 = vst [vmem:[#allocation3 + $0x1] sm:$0xff] %v384_v24  ;;  %v358_v25 = vpop.f32.mrf.mxu0 }
 0x10c   : > { %v359_v27 = vadd.f32 %v664_v19, %v358_v25 }
 0x10e   : > { %v382_v28 = vadd.f32 %v381_v26, %v359_v27 }
 0x110   : > { %v385_v29 = vmax.f32 %v382_v28, 0.0 }
 0x112   : > { %387 = vst [vmem:[%s276_s24 + $0x8] sm:$0xff] %v385_v29  ;;  %v392_v30 = vld [vmem:[#allocation3] sm:$0xff]  ;;  %490 = vmatmul.f32.gmra.mxu3 %v385_v29 }
 0x113   : > { %391 = vst [vmem:[#allocation3 + $0x9] sm:$0xff] %v385_v29  ;;  %464 = vmatmul.f32.vlgmr.msra.gmra.mxu2 %v392_v30 }
 0x11a   : > { %v393_v31 = vld [vmem:[#allocation3 + $0x8] sm:$0xff] }
 0x11b   : > { %v394_v32 = vld [vmem:[#allocation3 + $0x2] sm:$0xff]  ;;  %467 = vmatmul.f32.gmra.mxu2 %v393_v31  ;;  %v395_v33 = vld [vmem:[#allocation3 + $0xa] sm:$0xff] }
 0x11c   : > { %510 = vmatmul.f32.vlgmr.msrb.gmra.mxu1 %v394_v32 }
 0x124   : > { %513 = vmatmul.f32.gmra.mxu1 %v395_v33 }
 0x18d   : > { %v488_v35 = vpop.f32.mrf.mxu3 }
 0x195   : > { %v491_v44 = vpop.f32.mrf.mxu3 }
 0x196   : > { %v465_v36 = vpop.f32.mrf.mxu2 }
 0x197   : > { %v466_v37 = vadd.f32 %v665_v34, %v465_v36 }
 0x199   : > { %v511_v38 = vpop.f32.mrf.mxu1  ;;  %v489_v39 = vadd.f32 %v488_v35, %v466_v37 }
 0x19b   : > { %v512_v40 = vadd.f32 %v511_v38, %v489_v39 }
 0x19d   : > { %v517_v41 = vmax.f32 %v512_v40, 0.0 }
 0x19e   : > { %v468_v42 = vpop.f32.mrf.mxu2 }
 0x19f   : > { %519 = vst [vmem:[%s281_s29] sm:$0xff] %v517_v41  ;;  %v469_v43 = vadd.f32 %v665_v34, %v468_v42 }
 0x1a1   : > { %v492_v45 = vadd.f32 %v491_v44, %v469_v43  ;;  %v514_v46 = vpop.f32.mrf.mxu1 }
 0x1a3   : > { %v515_v47 = vadd.f32 %v514_v46, %v492_v45 }
 0x1a5   : > { %v518_v48 = vmax.f32 %v515_v47, 0.0 }
 0x1a7   : > { %520 = vst [vmem:[%s281_s29 + $0x8] sm:$0xff] %v518_v48 }
 0x1a8 PF: > { %s18_s21 = sadd.s32 1, %s706_s21  }
 0x1a9   : > { %p15_p7 = scmp.ge.s32.totalorder %s18_s21, 4  }
 0x1ab   :  { %17 = sbr.rel (!%p15_p7) target bundleno = 1 (0x1), region = 87 }
 0x1b0   :  { %558 = vsyncpa [#allocation5], 1 }
 0x1b1   :  { %560 = vsyncpa [#allocation5 + $0x1], 1 }

</bundles_post_ra>
